<compile_context>
chip_gen: v7x
topology: tpu7x:2x2x1
jax: 0.10.0
libtpu: 0.0.40
codegen_flags: <defaults>
</compile_context>

<pallas_src>
import functools

import jax
import jax.numpy as jnp
from jax.experimental import pallas as pl
from jax.experimental.pallas import tpu as pltpu

_LANE = 128
_BLOCK_BUDGET_BYTES = 4 * 1024 * 1024   # per (1, C, hw_tile) x-block
_VMEM_LIMIT_BYTES = 32 * 1024 * 1024    # == v6e/v7x scoped default, > v5e's 16 MiB


def _pick_hw_tile(hw, c, dtype_bytes, block_budget_bytes=_BLOCK_BUDGET_BYTES):
    """Lane-tile for the spatial axis.
    - full HW if the per-batch slab fits the block budget (enables fused path)
    - else the largest multiple of 128 that divides HW and fits the budget
    - else the largest 128-aligned tile that fits (grid over-covers HW; the
      reduction kernel masks the last tile, OOB output writes are dropped)."""
    cap = max(_LANE, (block_budget_bytes // (dtype_bytes * c)) // _LANE * _LANE)
    if hw <= cap:
        return hw
    best = 0
    t = _LANE
    while t <= cap:
        if hw % t == 0:
            best = t
        t += _LANE
    return best if best > 0 else cap


# ---------------------------------------------------------------------------
# Fused path: pool + MLP + multiply in one pass (grid = (B,))
# ---------------------------------------------------------------------------
def _fused_kernel(w1_ref, b1_ref, w2_ref, b2_ref, x_ref, o_ref):
    x = x_ref[...].astype(jnp.float32)                        # (1, C, HW)
    s = jnp.sum(x, axis=-1, keepdims=True)[0]                 # (C, 1) raw sum
    # 1/HW is pre-folded into w1, so the raw sum is the right input.
    h = jnp.dot(w1_ref[...], s,
                preferred_element_type=jnp.float32) + b1_ref[...]   # (hid, 1)
    h = jnp.maximum(h, 0.0)
    ca = jnp.dot(w2_ref[...], h,
                 preferred_element_type=jnp.float32) + b2_ref[...]  # (C, 1)
    o_ref[...] = (x * ca[None, :, :]).astype(o_ref.dtype)


# ---------------------------------------------------------------------------
# Two-pass path
# ---------------------------------------------------------------------------
def _gap_sum_kernel(x_ref, sum_ref, *, hw, hw_tile, needs_mask):
    """Accumulate the spatial sum into a resident (1, C, 1) output block."""
    t = pl.program_id(1)

    @pl.when(t == 0)
    def _():
        sum_ref[...] = jnp.zeros_like(sum_ref)

    x = x_ref[...].astype(jnp.float32)                        # (1, C, hw_tile)
    if needs_mask:  # last tile may over-run HW; zero the out-of-range lanes
        lane = jax.lax.broadcasted_iota(jnp.int32, x.shape, 2) + t * hw_tile
        x = jnp.where(lane < hw, x, 0.0)
    sum_ref[...] += jnp.sum(x, axis=-1, keepdims=True)


def _apply_kernel(ca_ref, x_ref, o_ref):
    """Lane-dense broadcast multiply: out = cattn * x."""
    x = x_ref[...].astype(jnp.float32)                        # (1, C, hw_tile)
    o_ref[...] = (x * ca_ref[...]).astype(o_ref.dtype)        # ca: (1, C, 1)


# ---------------------------------------------------------------------------
# Wrapper
# ---------------------------------------------------------------------------
@functools.partial(jax.jit, static_argnames=("block_budget_bytes",))
def channel_attention(x, w1, b1, w2, b2, *,
                      block_budget_bytes=_BLOCK_BUDGET_BYTES):
    """x: (B, C, H, W); w1: (C//r, C); b1: (C//r,); w2: (C, C//r); b2: (C,).
    Returns cattn * x with cattn = Conv1x1 -> ReLU -> Conv1x1 on the GAP."""
    B, C, H, W = x.shape
    hidden = w1.shape[0]
    HW = H * W
    inv_hw = 1.0 / float(HW)

    x3 = x.reshape(B, C, HW)                                  # free reshape

    # Fold 1/HW into the first conv weight: W1 @ (sum/HW) == (W1/HW) @ sum.
    w1m = w1.astype(jnp.float32) * inv_hw                     # (hidden, C)
    b1f = b1.astype(jnp.float32)
    w2m = w2.astype(jnp.float32)                              # (C, hidden)
    b2f = b2.astype(jnp.float32)

    hw_tile = _pick_hw_tile(HW, C, x.dtype.itemsize, block_budget_bytes)

    # ---------------- fused single-pass path ----------------
    if hw_tile == HW:
        const = lambda b: (0, 0)
        x_spec = pl.BlockSpec((1, C, HW), lambda b: (b, 0, 0))
        y3 = pl.pallas_call(
            _fused_kernel,
            out_shape=jax.ShapeDtypeStruct((B, C, HW), x.dtype),
            grid_spec=pltpu.PrefetchScalarGridSpec(
                num_scalar_prefetch=0,
                grid=(B,),
                in_specs=[
                    pl.BlockSpec((hidden, C), const),          # w1 (pre-scaled)
                    pl.BlockSpec((hidden, 1), const),          # b1
                    pl.BlockSpec((C, hidden), const),          # w2
                    pl.BlockSpec((C, 1), const),               # b2
                    x_spec,                                    # x
                ],
                out_specs=x_spec,
            ),
            compiler_params=pltpu.CompilerParams(
                dimension_semantics=("parallel",),
                vmem_limit_bytes=_VMEM_LIMIT_BYTES),
        )(w1m, b1f.reshape(hidden, 1), w2m, b2f.reshape(C, 1), x3)
        return y3.reshape(B, C, H, W)

    # ---------------- two-pass path ----------------
    n_t = pl.cdiv(HW, hw_tile)
    needs_mask = (HW % hw_tile) != 0
    x_spec = pl.BlockSpec((1, C, hw_tile), lambda b, t: (b, 0, t))

    # pass 1: global spatial sum -> (B, C, 1) f32
    gap_sum = pl.pallas_call(
        functools.partial(_gap_sum_kernel, hw=HW, hw_tile=hw_tile,
                          needs_mask=needs_mask),
        out_shape=jax.ShapeDtypeStruct((B, C, 1), jnp.float32),
        grid_spec=pltpu.PrefetchScalarGridSpec(
            num_scalar_prefetch=0,
            grid=(B, n_t),
            in_specs=[x_spec],
            out_specs=pl.BlockSpec((1, C, 1), lambda b, t: (b, 0, 0)),
        ),
        compiler_params=pltpu.CompilerParams(
            dimension_semantics=("parallel", "arbitrary"),
            vmem_limit_bytes=_VMEM_LIMIT_BYTES),
    )(x3)

    # tiny 1x1-conv MLP on (B, C), hoisted out of the per-tile kernel
    s = gap_sum[:, :, 0]                                      # (B, C) raw sums
    h = jnp.maximum(s @ w1m.T + b1f, 0.0)                     # (B, hidden)
    ca = (h @ w2m.T + b2f)[:, :, None]                        # (B, C, 1) f32

    # pass 2: broadcast multiply only
    y3 = pl.pallas_call(
        _apply_kernel,
        out_shape=jax.ShapeDtypeStruct((B, C, HW), x.dtype),
        grid_spec=pltpu.PrefetchScalarGridSpec(
            num_scalar_prefetch=0,
            grid=(B, n_t),
            in_specs=[
                pl.BlockSpec((1, C, 1), lambda b, t: (b, 0, 0)),   # cattn
                x_spec,                                            # x
            ],
            out_specs=x_spec,
        ),
        compiler_params=pltpu.CompilerParams(
            dimension_semantics=("parallel", "parallel"),
            vmem_limit_bytes=_VMEM_LIMIT_BYTES),
    )(ca, x3)

    return y3.reshape(B, C, H, W)


# ---------------------------------------------------------------------------
# Reference + test
# ---------------------------------------------------------------------------
def _ref_channel_attention(x, w1, b1, w2, b2):
    xf = x.astype(jnp.float32)
    gap = jnp.mean(xf, axis=(2, 3))                           # (B, C)
    h = jnp.maximum(gap @ w1.T + b1, 0.0)                     # (B, hidden)
    ca = h @ w2.T + b2                                        # (B, C)
    return (ca[:, :, None, None] * xf).astype(x.dtype)


def _run_case(key, B, C, H, W, reduction, block_budget_bytes):
    hidden = max(1, C // reduction)
    k1, k2, k3, k4, k5 = jax.random.split(key, 5)
    x = jax.random.normal(k1, (B, C, H, W), dtype=jnp.float32)
    w1 = 0.1 * jax.random.normal(k2, (hidden, C), dtype=jnp.float32)
    b1 = 0.1 * jax.random.normal(k3, (hidden,), dtype=jnp.float32)
    w2 = 0.1 * jax.random.normal(k4, (C, hidden), dtype=jnp.float32)
    b2 = 0.1 * jax.random.normal(k5, (C,), dtype=jnp.float32)

    out = channel_attention(x, w1, b1, w2, b2,
                            block_budget_bytes=block_budget_bytes)
    out = jax.block_until_ready(out)
    ref = _ref_channel_attention(x, w1, b1, w2, b2)
    ok = bool(jnp.allclose(out, ref, atol=1e-5, rtol=1e-5))
    if not ok:
        print("MISMATCH (B,C,H,W)=", (B, C, H, W),
              "max err", float(jnp.max(jnp.abs(out - ref))))
    return ok


if __name__ == "__main__":
    key = jax.random.PRNGKey(0)
    ks = jax.random.split(key, 3)
    ok = True
    # 1) Main case: fused single-pass path (per-batch slab fits one block).
    ok &= _run_case(ks[0], B=2, C=32, H=16, W=16, reduction=8,
                    block_budget_bytes=_BLOCK_BUDGET_BYTES)
    # 2) Two-pass path (tiny budget forces tiling: HW=256 -> two 128-lane tiles).
    ok &= _run_case(ks[1], B=2, C=32, H=16, W=16, reduction=8,
                    block_budget_bytes=16 * 1024)
    # 3) Two-pass path with a masked last tile (HW=144 has no 128-mult divisor).
    ok &= _run_case(ks[2], B=1, C=16, H=12, W=12, reduction=4,
                    block_budget_bytes=8 * 1024)

    if ok:
        print("KERNEL_OK")
</pallas_src>

<mosaic_0001>
module attributes {stable_mosaic.version = 11 : i64} {
  func.func @_fused_kernel(%arg0: i32, %arg1: memref<4x32xf32, #tpu.memory_space<vmem>>, %arg2: memref<4x1xf32, #tpu.memory_space<vmem>>, %arg3: memref<32x4xf32, #tpu.memory_space<vmem>>, %arg4: memref<32x1xf32, #tpu.memory_space<vmem>>, %arg5: memref<1x32x256xf32, #tpu.memory_space<vmem>>, %arg6: memref<1x32x256xf32, #tpu.memory_space<vmem>>) attributes {dimension_semantics = [#tpu.dimension_semantics<parallel>], iteration_bounds = array<i64: 2>, scalar_prefetch = 0 : i64, scratch_operands = 0 : i64, tpu.core_type = #tpu.core_type<tc>, window_params = [{pipeline_mode = #tpu.pipeline_mode<synchronous>, transform_indices = @transform_0, window_bounds = array<i64: 4, 32>}, {pipeline_mode = #tpu.pipeline_mode<synchronous>, transform_indices = @transform_1, window_bounds = array<i64: 4, 1>}, {pipeline_mode = #tpu.pipeline_mode<synchronous>, transform_indices = @transform_2, window_bounds = array<i64: 32, 4>}, {pipeline_mode = #tpu.pipeline_mode<synchronous>, transform_indices = @transform_3, window_bounds = array<i64: 32, 1>}, {transform_indices = @transform_4, window_bounds = array<i64: 1, 32, 256>}, {transform_indices = @transform_5, window_bounds = array<i64: 1, 32, 256>}]} {
    %c0 = arith.constant 0 : index
    %c0_0 = arith.constant 0 : index
    %c0_1 = arith.constant 0 : index
    %0 = vector.load %arg5[%c0, %c0_0, %c0_1] : memref<1x32x256xf32, #tpu.memory_space<vmem>>, vector<1x32x256xf32>
    %cst = arith.constant dense<0.000000e+00> : vector<1x32xf32>
    %1 = vector.multi_reduction <add>, %0, %cst [2] : vector<1x32x256xf32> to vector<1x32xf32>
    %2 = vector.shape_cast %1 : vector<1x32xf32> to vector<1x32x1xf32>
    %3 = vector.shape_cast %2 : vector<1x32x1xf32> to vector<32x1xf32>
    %c0_2 = arith.constant 0 : index
    %c0_3 = arith.constant 0 : index
    %4 = vector.load %arg1[%c0_2, %c0_3] : memref<4x32xf32, #tpu.memory_space<vmem>>, vector<4x32xf32>
    %cst_4 = arith.constant dense<0.000000e+00> : vector<4x1xf32>
    %5 = tpu.matmul %4, %3, %cst_4 {dimension_numbers = #tpu.dot_dimension_numbers<[1], [0], [0], [1], [0, 0, 1, 1], [], []>} : vector<4x32xf32>, vector<32x1xf32>, vector<4x1xf32> -> vector<4x1xf32>
    %c0_5 = arith.constant 0 : index
    %c0_6 = arith.constant 0 : index
    %6 = vector.load %arg2[%c0_5, %c0_6] : memref<4x1xf32, #tpu.memory_space<vmem>>, vector<4x1xf32>
    %7 = arith.addf %5, %6 : vector<4x1xf32>
    %cst_7 = arith.constant 0.000000e+00 : f32
    %8 = vector.broadcast %cst_7 : f32 to vector<4x1xf32>
    %9 = arith.maximumf %7, %8 : vector<4x1xf32>
    %c0_8 = arith.constant 0 : index
    %c0_9 = arith.constant 0 : index
    %10 = vector.load %arg3[%c0_8, %c0_9] : memref<32x4xf32, #tpu.memory_space<vmem>>, vector<32x4xf32>
    %cst_10 = arith.constant dense<0.000000e+00> : vector<32x1xf32>
    %11 = tpu.matmul %10, %9, %cst_10 {dimension_numbers = #tpu.dot_dimension_numbers<[1], [0], [0], [1], [0, 0, 1, 1], [], []>} : vector<32x4xf32>, vector<4x1xf32>, vector<32x1xf32> -> vector<32x1xf32>
    %c0_11 = arith.constant 0 : index
    %c0_12 = arith.constant 0 : index
    %12 = vector.load %arg4[%c0_11, %c0_12] : memref<32x1xf32, #tpu.memory_space<vmem>>, vector<32x1xf32>
    %13 = arith.addf %11, %12 : vector<32x1xf32>
    %14 = vector.shape_cast %13 : vector<32x1xf32> to vector<1x32x1xf32>
    %15 = vector.broadcast %14 : vector<1x32x1xf32> to vector<1x32x256xf32>
    %16 = arith.mulf %0, %15 : vector<1x32x256xf32>
    %c0_13 = arith.constant 0 : index
    %c0_14 = arith.constant 0 : index
    %c0_15 = arith.constant 0 : index
    %17 = vector.load %arg6[%c0_13, %c0_14, %c0_15] : memref<1x32x256xf32, #tpu.memory_space<vmem>>, vector<1x32x256xf32>
    tpu.vector_store %arg6[%c0_13, %c0_14, %c0_15], %16 {strides = array<i32>} : memref<1x32x256xf32, #tpu.memory_space<vmem>>, vector<1x32x256xf32>,
    return
  }
  func.func @transform_0(%arg0: i32) -> (i32, i32) {
    %c0_i32 = arith.constant 0 : i32
    %c0_i32_0 = arith.constant 0 : i32
    %c0_i32_1 = arith.constant 0 : i32
    return %c0_i32, %c0_i32_0 : i32, i32
  }
  func.func @transform_1(%arg0: i32) -> (i32, i32) {
    %c0_i32 = arith.constant 0 : i32
    %c0_i32_0 = arith.constant 0 : i32
    %c0_i32_1 = arith.constant 0 : i32
    return %c0_i32, %c0_i32_0 : i32, i32
  }
  func.func @transform_2(%arg0: i32) -> (i32, i32) {
    %c0_i32 = arith.constant 0 : i32
    %c0_i32_0 = arith.constant 0 : i32
    %c0_i32_1 = arith.constant 0 : i32
    return %c0_i32, %c0_i32_0 : i32, i32
  }
  func.func @transform_3(%arg0: i32) -> (i32, i32) {
    %c0_i32 = arith.constant 0 : i32
    %c0_i32_0 = arith.constant 0 : i32
    %c0_i32_1 = arith.constant 0 : i32
    return %c0_i32, %c0_i32_0 : i32, i32
  }
  func.func @transform_4(%arg0: i32) -> (i32, i32, i32) {
    %c0_i32 = arith.constant 0 : i32
    %c0_i32_0 = arith.constant 0 : i32
    %c0_i32_1 = arith.constant 0 : i32
    return %arg0, %c0_i32, %c0_i32_0 : i32, i32, i32
  }
  func.func @transform_5(%arg0: i32) -> (i32, i32, i32) {
    %c0_i32 = arith.constant 0 : i32
    %c0_i32_0 = arith.constant 0 : i32
    %c0_i32_1 = arith.constant 0 : i32
    return %arg0, %c0_i32, %c0_i32_0 : i32, i32, i32
  }
}

</mosaic_0001>

<bundles_post_ra>
// kernel: channel_attention.1
= control target key start
LH: loop header
LB: loop body
LE: loop exit
PB: predicated region body
PF: predicated region fallthrough
CT: control target
= control target key end

     0   :  { %s633_s18 = smov 0   ;;  %s719_s0 = inlined_call_operand.vmem [shape: f32[4,32], index: 0, kind: input, shape index: {}]   ;;  %s720_s1 = inlined_call_operand.vmem [shape: f32[4,1], index: 1, kind: input, shape index: {}]   ;;  %s721_s2 = inlined_call_operand.vmem [shape: f32[32,4], index: 2, kind: input, shape index: {}]   ;;  %s722_s3 = inlined_call_operand.vmem [shape: f32[32,1], index: 3, kind: input, shape index: {}]   ;;  %s723_s4 = inlined_call_operand.vmem [shape: f32[2,32,256], index: 4, kind: input, shape index: {}]   ;;  %s724_s5 = inlined_call_operand.vmem [shape: f32[2,32,256], index: 5, kind: output, shape index: {}]  }
   0x1 LB: > { %s523_s19 = sadd.s32 4294967295, %s597_s18   ;;  %p527_p0 = scmp.ge.s32.totalorder %s597_s18, 1  ;;  %s597_s18 = sphi %s633_s18, %s15_s18  }
   0x2   : > { %p187_p1 = scmp.lt.s32.totalorder %s597_s18, 3 }
   0x4   : > { %p188_p2 = pnand %p527_p0, %p187_p1 }
   0x5   : > { %p215_p3 = scmp.lt.s32.totalorder (!%p188_p2), %s523_s19, 1  ;;  %v599_v12 = vmov (!%p188_p2), 0.0|0.0   ;;  %vm600_vm0 = vmmov (!%p188_p2), 0   ;;  %v601_v13 = vmov (!%p188_p2), 0.0   ;;  %v245_v20 = vld [vmem:[%s719_s0] sm:$0xf] (!%p188_p2) }
   0x6   : > { %191 = sbr.rel (%p188_p2) target bundleno = 747 (0x2eb), region = 40  ;;  %571 = vmatprep.subr.bf16.mxu0 (!%p188_p2), %v599_v12  ;;  %560 = vmatprep.mubr.msk.f32.mxu0 (!%p188_p2), %vm600_vm0, %v601_v13  ;;  %vm247_vm1 = vcmask (!%p188_p2), 261120   ;;  %v322_v21 = vld [vmem:[%s721_s2] sm:$0xff] (!%p188_p2)  ;;  %vm330_vm2 = vcmask (!%p188_p2), 31744   ;;  %vm343_vm3 = vcmask (!%p188_p2), 1043456   ;;  %v323_v27 = vld [vmem:[%s721_s2 + $0x8] sm:$0xff] (!%p188_p2) }
   0x7   : > { %565 = vmatprep.mubr.msk.f32.mxu1 (!%p188_p2), %vm330_vm2, %v322_v21  ;;  %v246_v22 = vld [vmem:[%s720_s1] sm:$0xf] (!%p188_p2)  ;;  %v324_v28 = vld [vmem:[%s721_s2 + $0x10] sm:$0xff] (!%p188_p2)  ;;  %v325_v29 = vld [vmem:[%s721_s2 + $0x18] sm:$0xff] (!%p188_p2)  ;;  %v602_v30 = vmov (!%p188_p2), 0  }
   0x8   : > { %590 = vset.pattern.permute.xlu1 (!%p188_p2), %v602_v30  ;;  %589 = vset.pattern.permute.xlu0 (!%p188_p2), %v602_v30  ;;  %v327_v31 = vld [vmem:[%s722_s3 + $0x8] sm:$0xff] (!%p188_p2)  ;;  %v326_v32 = vld [vmem:[%s722_s3] sm:$0xff] (!%p188_p2)  ;;  %v328_v37 = vld [vmem:[%s722_s3 + $0x10] sm:$0xff] (!%p188_p2) }
   0x9   : > { %v329_v41 = vld [vmem:[%s722_s3 + $0x18] sm:$0xff] (!%p188_p2) }
   0xd   : > { %s726_s19 = smov (!%p215_p3, %s523_s19), 1 }
   0xe   : > { %s540_s20 = sshll.u32 %s726_s19, 6 }
   0xf   : > { %s219_s23 = scalar_lea.vmem %s723_s4, %s540_s20  ;;  %s224_s24 = scalar_lea.vmem %s724_s5, %s540_s20 }
  0x10   : > { %v649_v0 = vld [vmem:[%s219_s23 + $0x20] sm:$0xff]  ;;  %v651_v1 = vld [vmem:[%s219_s23 + $0x28] sm:$0xff]  ;;  %v659_v5 = vld [vmem:[%s219_s23 + $0x30] sm:$0xff] }
  0x11   : > { %v653_v2 = vld [vmem:[%s219_s23] sm:$0xff]  ;;  %v239_v3 = vadd.f32 %v651_v1, %v649_v0  ;;  %v657_v4 = vld [vmem:[%s219_s23 + $0x8] sm:$0xff]  ;;  %v661_v6 = vld [vmem:[%s219_s23 + $0x38] sm:$0xff] }
  0x12   : > { %v233_v7 = vadd.f32 %v657_v4, %v653_v2  ;;  %v665_v8 = vld [vmem:[%s219_s23 + $0x10] sm:$0xff]  ;;  %v667_v9 = vld [vmem:[%s219_s23 + $0x18] sm:$0xff]  ;;  %v242_v10 = vadd.f32 %v661_v6, %v659_v5 }
  0x13   : > { %240 = vadd.xlane.f32.xlu1 %v239_v3  ;;  %v236_v11 = vadd.f32 %v667_v9, %v665_v8 }
  0x14   : > { %234 = vadd.xlane.f32.xlu0 %v233_v7 }
  0x17   : > { %243 = vadd.xlane.f32.xlu1 %v242_v10 }
  0x18   : > { %237 = vadd.xlane.f32.xlu0 %v236_v11 }
  0xa0   : > { %v241_v14 = vpop.xlane.xlu1 %240 }
  0xa1   : > { %v235_v15 = vpop.xlane.xlu0 %234 }
  0xa4   : > { %v244_v18 = vpop.xlane.xlu1 %243 }
  0xa5   : > { %v238_v16 = vpop.xlane.xlu0 %237  ;;  %v575_v19 = vpack.c.bf16 %v244_v18, %v241_v14 }
  0xa6   : > { %v572_v17 = vpack.c.bf16 %v238_v16, %v235_v15 }
  0xa8   : > { %573 = vmatpush3.bf16.msra.mxu0 %v572_v17 }
  0xa9   : > { %574 = vmatprep.subr.bf16.mxu0 %v599_v12 }
  0xac   : > { %576 = vmatpush3.bf16.msra.mxu0 %v575_v19 }
  0xaf   : > { %561 = vmatmul.mubr.msk.f32.vlgmr.msra.gmra.mrb[0].mxu0 %vm247_vm1, %v245_v20 }
 0x182   : > { %v317_v23 = vpop.f32.mrb[0].mxu0 }
 0x183   : > { %v318_v24 = vadd.f32 %v317_v23, %v246_v22  ;;  %v562_v25 = vpop.f32.mrb[1].mxu0 }
 0x185   : > { %v321_v26 = vmax.f32 %v318_v24, 0.0 }
 0x187   : > { %563 = vmatprep.subr.msk.mxu1 %vm343_vm3, %v321_v26 }
 0x188   : > { %564 = vmatpush3.msk.msra.mxu1 %vm343_vm3, %v321_v26 }
 0x189   : > { %566 = vmatmul.mubr.msk.f32.vlgmr.msra.gmra.mrb[0].mxu1 %vm330_vm2, %v323_v27 }
 0x18a   : > { %568 = vmatprep.mubr.msk.f32.mxu1 %vm330_vm2, %v324_v28 }
 0x18d   : > { %569 = vmatmul.mubr.msk.f32.gmra.mrb[2].mxu1 %vm330_vm2, %v325_v29 }
 0x25c   : > { %v567_v33 = vpop.f32.mrb[0].mxu1 }
 0x25d   : > { %v419_v34 = vadd.f32 %v567_v33, %v327_v31  ;;  %v413_v35 = vpop.f32.mrb[1].mxu1 }
 0x25e   : > { %v414_v36 = vadd.f32 %v413_v35, %v326_v32 }
 0x25f   : > { %439 = vperm.xlu1 %590, %v419_v34  }
 0x260   : > { %v570_v38 = vpop.f32.mrb[2].mxu1  ;;  %434 = vperm.xlu0 %589, %v414_v36  }
 0x261   : > { %v423_v39 = vpop.f32.mrb[3].mxu1  ;;  %v429_v42 = vadd.f32 %v570_v38, %v329_v41 }
 0x262   : > { %v424_v40 = vadd.f32 %v423_v39, %v328_v37 }
 0x264   : > { %444 = vperm.xlu1 %590, %v424_v40  }
 0x268   : > { %449 = vperm.xlu1 %590, %v429_v42  }
 0x2de   : > { %v440_v43 = vpop.permute.xlu1 %439 }
 0x2df   : > { %v454_v44 = vmul.f32 %v440_v43, %v665_v8  ;;  %v455_v45 = vmul.f32 %v440_v43, %v667_v9  ;;  %v435_v46 = vpop.permute.xlu0 %434 }
 0x2e0   : > { %v452_v47 = vmul.f32 %v435_v46, %v653_v2  ;;  %v453_v48 = vmul.f32 %v435_v46, %v657_v4 }
 0x2e1   : > { %462 = vst [vmem:[%s224_s24 + $0x10] sm:$0xff] %v454_v44  ;;  %463 = vst [vmem:[%s224_s24 + $0x18] sm:$0xff] %v455_v45 }
 0x2e2   : > { %460 = vst [vmem:[%s224_s24] sm:$0xff] %v452_v47  ;;  %461 = vst [vmem:[%s224_s24 + $0x8] sm:$0xff] %v453_v48 }
 0x2e3   : > { %v445_v49 = vpop.permute.xlu1 %444 }
 0x2e4   : > { %v456_v50 = vmul.f32 %v445_v49, %v649_v0  ;;  %v457_v51 = vmul.f32 %v445_v49, %v651_v1 }
 0x2e6   : > { %464 = vst [vmem:[%s224_s24 + $0x20] sm:$0xff] %v456_v50  ;;  %465 = vst [vmem:[%s224_s24 + $0x28] sm:$0xff] %v457_v51 }
 0x2e7   : > { %v450_v52 = vpop.permute.xlu1 %449 }
 0x2e8   : > { %v458_v53 = vmul.f32 %v450_v52, %v659_v5  ;;  %v459_v54 = vmul.f32 %v450_v52, %v661_v6 }
 0x2ea   : > { %466 = vst [vmem:[%s224_s24 + $0x30] sm:$0xff] %v458_v53  ;;  %467 = vst [vmem:[%s224_s24 + $0x38] sm:$0xff] %v459_v54 }
 0x2eb PF: > { %s15_s18 = sadd.s32 1, %s597_s18  }
 0x2ec   : > { %p12_p4 = scmp.ge.s32.totalorder %s15_s18, 4  }
 0x2ee   :  { %14 = sbr.rel (!%p12_p4) target bundleno = 1 (0x1), region = 70 }

</bundles_post_ra>
